<compile_context>
chip_gen: v7x
topology: tpu7x:2x2x1
jax: 0.10.0
libtpu: 0.0.40
codegen_flags: <defaults>
</compile_context>

<pallas_src>
import functools

import jax
import jax.numpy as jnp
from jax.experimental import pallas as pl
from jax.experimental.pallas import tpu as pltpu


def _round_up(n, m):
    return ((n + m - 1) // m) * m


def mlp_kernel(x_ref, w1_ref, b1_ref, w2_ref, b2_ref, w3_ref, b3_ref, o_ref):
    # fc1 + ReLU  (bf16 inputs, f32 accumulate)
    h1 = jnp.dot(x_ref[...], w1_ref[...], preferred_element_type=jnp.float32)
    h1 = jnp.maximum(h1 + b1_ref[...], 0.0).astype(w2_ref.dtype)
    # fc2 + ReLU
    h2 = jnp.dot(h1, w2_ref[...], preferred_element_type=jnp.float32)
    h2 = jnp.maximum(h2 + b2_ref[...], 0.0).astype(w3_ref.dtype)
    # fc3 (no activation); output columns beyond act_dim are zero-padded.
    out = jnp.dot(h2, w3_ref[...], preferred_element_type=jnp.float32)
    o_ref[...] = (out + b3_ref[...]).astype(o_ref.dtype)


@functools.partial(jax.jit, static_argnames=("tile_b",))
def mlp_forward(x, w1, b1, w2, b2, w3, b3, *, tile_b=256):
    """x: (B, obs_dim) f32. Weights in (in, out) layout; biases (1, out)."""
    B, obs_dim = x.shape
    hid = w1.shape[1]
    act_dim = w3.shape[1]
    out_pad = _round_up(act_dim, 128)          # lane-dense output slab

    # Batch tile: MXU-sized (256) for real batches, shrunk for tiny ones.
    tile_b = min(tile_b, _round_up(B, 8))
    b_pad = _round_up(B, tile_b)

    # Pad batch; cast streaming input + weights to bf16 (f32 accumulate in-kernel).
    x_p = x if b_pad == B else jnp.pad(x, ((0, b_pad - B), (0, 0)))
    x_p = x_p.astype(jnp.bfloat16)
    w1b = w1.astype(jnp.bfloat16)
    w2b = w2.astype(jnp.bfloat16)
    w3b = jnp.pad(w3, ((0, 0), (0, out_pad - act_dim))).astype(jnp.bfloat16)
    b1f = b1.astype(jnp.float32)
    b2f = b2.astype(jnp.float32)
    b3f = jnp.pad(b3, ((0, 0), (0, out_pad - act_dim))).astype(jnp.float32)

    num_tiles = pl.cdiv(b_pad, tile_b)

    resident = lambda i: (0, 0)                # weights/biases: VMEM-resident
    streamed = lambda i: (i, 0)                # x / out: pipelined batch tiles

    bytes_accessed = (
        x_p.size * x_p.dtype.itemsize
        + w1b.size * 2 + w2b.size * 2 + w3b.size * 2
        + b1f.size * 4 + b2f.size * 4 + b3f.size * 4
        + b_pad * out_pad * 4
    )
    cost = pl.CostEstimate(
        flops=2 * b_pad * (obs_dim * hid + hid * hid + hid * out_pad),
        transcendentals=0,
        bytes_accessed=bytes_accessed,
    )

    out = pl.pallas_call(
        mlp_kernel,
        out_shape=jax.ShapeDtypeStruct((b_pad, out_pad), jnp.float32),
        grid=(num_tiles,),
        in_specs=[
            pl.BlockSpec((tile_b, obs_dim), streamed),   # x tile
            pl.BlockSpec((obs_dim, hid), resident),      # w1
            pl.BlockSpec((1, hid), resident),            # b1
            pl.BlockSpec((hid, hid), resident),          # w2
            pl.BlockSpec((1, hid), resident),            # b2
            pl.BlockSpec((hid, out_pad), resident),      # w3 (lane-padded)
            pl.BlockSpec((1, out_pad), resident),        # b3 (lane-padded)
        ],
        out_specs=pl.BlockSpec((tile_b, out_pad), streamed),
        compiler_params=pltpu.CompilerParams(
            dimension_semantics=("parallel",),
        ),
        cost_estimate=cost,
    )(x_p, w1b, b1f, w2b, b2f, w3b, b3f)

    return out[:B, :act_dim]


def xavier_uniform(key, fan_in, fan_out, dtype=jnp.float32):
    # Matches torch.nn.init.xavier_uniform_: U(-a, a), a = sqrt(6/(fan_in+fan_out)).
    bound = (6.0 / (fan_in + fan_out)) ** 0.5
    # PyTorch weight shape is (out, in); sample that shape then transpose to (in, out).
    w = jax.random.uniform(key, (fan_out, fan_in), dtype, -bound, bound)
    return w.T


def make_params(key, obs_dim, act_dim, hid_dim=128):
    k1, k2, k3 = jax.random.split(key, 3)
    w1 = xavier_uniform(k1, obs_dim, hid_dim)
    w2 = xavier_uniform(k2, hid_dim, hid_dim)
    w3 = xavier_uniform(k3, hid_dim, act_dim)
    b1 = jnp.full((1, hid_dim), 0.01, jnp.float32)
    b2 = jnp.full((1, hid_dim), 0.01, jnp.float32)
    b3 = jnp.full((1, act_dim), 0.01, jnp.float32)
    return w1, b1, w2, b2, w3, b3


def mlp_reference(x, w1, b1, w2, b2, w3, b3):
    h1 = jnp.maximum(x @ w1 + b1, 0.0)
    h2 = jnp.maximum(h1 @ w2 + b2, 0.0)
    return h2 @ w3 + b3


if __name__ == "__main__":
    obs_dim, act_dim, hid_dim = 32, 8, 128

    key = jax.random.PRNGKey(0)
    k_x, k_x2, k_p = jax.random.split(key, 3)
    params = make_params(k_p, obs_dim, act_dim, hid_dim)

    # Small batch (single grid step, tile shrunk to 8 rows).
    x_small = jax.random.normal(k_x, (8, obs_dim), jnp.float32)
    out_small = jax.block_until_ready(mlp_forward(x_small, *params))
    ref_small = mlp_reference(x_small, *params)
    assert out_small.shape == (8, act_dim)
    assert jnp.allclose(out_small, ref_small, atol=5e-2, rtol=5e-2), \
        "small-batch mismatch vs reference"

    # Non-divisible batch exercising the grid + batch padding path (2 tiles of 256).
    x_big = jax.random.normal(k_x2, (300, obs_dim), jnp.float32)
    out_big = jax.block_until_ready(mlp_forward(x_big, *params))
    ref_big = mlp_reference(x_big, *params)
    assert out_big.shape == (300, act_dim)
    assert jnp.allclose(out_big, ref_big, atol=5e-2, rtol=5e-2), \
        "gridded-batch mismatch vs reference"

    print("KERNEL_OK")
</pallas_src>

<mosaic_0001>
module attributes {stable_mosaic.version = 11 : i64} {
  func.func @mlp_kernel(%arg0: i32, %arg1: memref<8x32xbf16, #tpu.memory_space<vmem>>, %arg2: memref<32x128xbf16, #tpu.memory_space<vmem>>, %arg3: memref<1x128xf32, #tpu.memory_space<vmem>>, %arg4: memref<128x128xbf16, #tpu.memory_space<vmem>>, %arg5: memref<1x128xf32, #tpu.memory_space<vmem>>, %arg6: memref<128x128xbf16, #tpu.memory_space<vmem>>, %arg7: memref<1x128xf32, #tpu.memory_space<vmem>>, %arg8: memref<8x128xf32, #tpu.memory_space<vmem>>) attributes {dimension_semantics = [#tpu.dimension_semantics<parallel>], iteration_bounds = array<i64: 1>, scalar_prefetch = 0 : i64, scratch_operands = 0 : i64, tpu.core_type = #tpu.core_type<tc>, window_params = [{transform_indices = @transform_0, window_bounds = array<i64: 8, 32>}, {pipeline_mode = #tpu.pipeline_mode<synchronous>, transform_indices = @transform_1, window_bounds = array<i64: 32, 128>}, {pipeline_mode = #tpu.pipeline_mode<synchronous>, transform_indices = @transform_2, window_bounds = array<i64: 1, 128>}, {pipeline_mode = #tpu.pipeline_mode<synchronous>, transform_indices = @transform_3, window_bounds = array<i64: 128, 128>}, {pipeline_mode = #tpu.pipeline_mode<synchronous>, transform_indices = @transform_4, window_bounds = array<i64: 1, 128>}, {pipeline_mode = #tpu.pipeline_mode<synchronous>, transform_indices = @transform_5, window_bounds = array<i64: 128, 128>}, {pipeline_mode = #tpu.pipeline_mode<synchronous>, transform_indices = @transform_6, window_bounds = array<i64: 1, 128>}, {transform_indices = @transform_7, window_bounds = array<i64: 8, 128>}]} {
    %c0 = arith.constant 0 : index
    %c0_0 = arith.constant 0 : index
    %0 = vector.load %arg1[%c0, %c0_0] : memref<8x32xbf16, #tpu.memory_space<vmem>>, vector<8x32xbf16>
    %c0_1 = arith.constant 0 : index
    %c0_2 = arith.constant 0 : index
    %1 = vector.load %arg2[%c0_1, %c0_2] : memref<32x128xbf16, #tpu.memory_space<vmem>>, vector<32x128xbf16>
    %cst = arith.constant dense<0.000000e+00> : vector<8x128xf32>
    %2 = tpu.matmul %0, %1, %cst {dimension_numbers = #tpu.dot_dimension_numbers<[1], [0], [0], [1], [0, 0, 1, 1], [], []>} : vector<8x32xbf16>, vector<32x128xbf16>, vector<8x128xf32> -> vector<8x128xf32>
    %c0_3 = arith.constant 0 : index
    %c0_4 = arith.constant 0 : index
    %3 = vector.load %arg3[%c0_3, %c0_4] : memref<1x128xf32, #tpu.memory_space<vmem>>, vector<1x128xf32>
    %4 = vector.broadcast %3 : vector<1x128xf32> to vector<8x128xf32>
    %5 = arith.addf %2, %4 : vector<8x128xf32>
    %cst_5 = arith.constant 0.000000e+00 : f32
    %6 = vector.broadcast %cst_5 : f32 to vector<8x128xf32>
    %7 = arith.maximumf %5, %6 : vector<8x128xf32>
    %8 = arith.truncf %7 : vector<8x128xf32> to vector<8x128xbf16>
    %c0_6 = arith.constant 0 : index
    %c0_7 = arith.constant 0 : index
    %9 = vector.load %arg4[%c0_6, %c0_7] : memref<128x128xbf16, #tpu.memory_space<vmem>>, vector<128x128xbf16>
    %cst_8 = arith.constant dense<0.000000e+00> : vector<8x128xf32>
    %10 = tpu.matmul %8, %9, %cst_8 {dimension_numbers = #tpu.dot_dimension_numbers<[1], [0], [0], [1], [0, 0, 1, 1], [], []>} : vector<8x128xbf16>, vector<128x128xbf16>, vector<8x128xf32> -> vector<8x128xf32>
    %c0_9 = arith.constant 0 : index
    %c0_10 = arith.constant 0 : index
    %11 = vector.load %arg5[%c0_9, %c0_10] : memref<1x128xf32, #tpu.memory_space<vmem>>, vector<1x128xf32>
    %12 = vector.broadcast %11 : vector<1x128xf32> to vector<8x128xf32>
    %13 = arith.addf %10, %12 : vector<8x128xf32>
    %cst_11 = arith.constant 0.000000e+00 : f32
    %14 = vector.broadcast %cst_11 : f32 to vector<8x128xf32>
    %15 = arith.maximumf %13, %14 : vector<8x128xf32>
    %16 = arith.truncf %15 : vector<8x128xf32> to vector<8x128xbf16>
    %c0_12 = arith.constant 0 : index
    %c0_13 = arith.constant 0 : index
    %17 = vector.load %arg6[%c0_12, %c0_13] : memref<128x128xbf16, #tpu.memory_space<vmem>>, vector<128x128xbf16>
    %cst_14 = arith.constant dense<0.000000e+00> : vector<8x128xf32>
    %18 = tpu.matmul %16, %17, %cst_14 {dimension_numbers = #tpu.dot_dimension_numbers<[1], [0], [0], [1], [0, 0, 1, 1], [], []>} : vector<8x128xbf16>, vector<128x128xbf16>, vector<8x128xf32> -> vector<8x128xf32>
    %c0_15 = arith.constant 0 : index
    %c0_16 = arith.constant 0 : index
    %19 = vector.load %arg7[%c0_15, %c0_16] : memref<1x128xf32, #tpu.memory_space<vmem>>, vector<1x128xf32>
    %20 = vector.broadcast %19 : vector<1x128xf32> to vector<8x128xf32>
    %21 = arith.addf %18, %20 : vector<8x128xf32>
    %c0_17 = arith.constant 0 : index
    %c0_18 = arith.constant 0 : index
    %22 = vector.load %arg8[%c0_17, %c0_18] : memref<8x128xf32, #tpu.memory_space<vmem>>, vector<8x128xf32>
    tpu.vector_store %arg8[%c0_17, %c0_18], %21 {strides = array<i32>} : memref<8x128xf32, #tpu.memory_space<vmem>>, vector<8x128xf32>,
    return
  }
  func.func @transform_0(%arg0: i32) -> (i32, i32) {
    %c0_i32 = arith.constant 0 : i32
    %c0_i32_0 = arith.constant 0 : i32
    return %arg0, %c0_i32 : i32, i32
  }
  func.func @transform_1(%arg0: i32) -> (i32, i32) {
    %c0_i32 = arith.constant 0 : i32
    %c0_i32_0 = arith.constant 0 : i32
    %c0_i32_1 = arith.constant 0 : i32
    return %c0_i32, %c0_i32_0 : i32, i32
  }
  func.func @transform_2(%arg0: i32) -> (i32, i32) {
    %c0_i32 = arith.constant 0 : i32
    %c0_i32_0 = arith.constant 0 : i32
    %c0_i32_1 = arith.constant 0 : i32
    return %c0_i32, %c0_i32_0 : i32, i32
  }
  func.func @transform_3(%arg0: i32) -> (i32, i32) {
    %c0_i32 = arith.constant 0 : i32
    %c0_i32_0 = arith.constant 0 : i32
    %c0_i32_1 = arith.constant 0 : i32
    return %c0_i32, %c0_i32_0 : i32, i32
  }
  func.func @transform_4(%arg0: i32) -> (i32, i32) {
    %c0_i32 = arith.constant 0 : i32
    %c0_i32_0 = arith.constant 0 : i32
    %c0_i32_1 = arith.constant 0 : i32
    return %c0_i32, %c0_i32_0 : i32, i32
  }
  func.func @transform_5(%arg0: i32) -> (i32, i32) {
    %c0_i32 = arith.constant 0 : i32
    %c0_i32_0 = arith.constant 0 : i32
    %c0_i32_1 = arith.constant 0 : i32
    return %c0_i32, %c0_i32_0 : i32, i32
  }
  func.func @transform_6(%arg0: i32) -> (i32, i32) {
    %c0_i32 = arith.constant 0 : i32
    %c0_i32_0 = arith.constant 0 : i32
    %c0_i32_1 = arith.constant 0 : i32
    return %c0_i32, %c0_i32_0 : i32, i32
  }
  func.func @transform_7(%arg0: i32) -> (i32, i32) {
    %c0_i32 = arith.constant 0 : i32
    %c0_i32_0 = arith.constant 0 : i32
    return %arg0, %c0_i32 : i32, i32
  }
}

</mosaic_0001>

<bundles_post_ra>
// kernel: mlp_forward.1
= control target key start
LH: loop header
LB: loop body
LE: loop exit
PB: predicated region body
PF: predicated region fallthrough
CT: control target
= control target key end

     0   :  { %v473_v1 = vmov 0.0   ;;  %vm474_vm0 = vmmov 0   ;;  %vm52_vm1 = vcmask 261120   ;;  %s618_s0 = inlined_call_operand.vmem [shape: bf16[8,32], index: 0, kind: input, shape index: {}]   ;;  %s619_s1 = inlined_call_operand.vmem [shape: bf16[32,128], index: 1, kind: input, shape index: {}]   ;;  %s620_s2 = inlined_call_operand.vmem [shape: f32[1,128], index: 2, kind: input, shape index: {}]   ;;  %s621_s3 = inlined_call_operand.vmem [shape: bf16[128,128], index: 3, kind: input, shape index: {}]   ;;  %s622_s4 = inlined_call_operand.vmem [shape: f32[1,128], index: 4, kind: input, shape index: {}]   ;;  %s623_s5 = inlined_call_operand.vmem [shape: bf16[128,128], index: 5, kind: input, shape index: {}]   ;;  %s624_s6 = inlined_call_operand.vmem [shape: f32[1,128], index: 6, kind: input, shape index: {}]   ;;  %s625_s7 = inlined_call_operand.hbm [shape: f32[8,128], index: 7, kind: output, shape index: {}]  }
   0x1   :  { %v431_v0 = vld [vmem:[%s619_s1] sm:$0xff]   ;;  %380 = vmatprep.subr.bf16.mxu0 %v473_v1  ;;  %388 = vmatprep.subr.bf16.mxu1 %v473_v1  ;;  %v432_v2 = vld [vmem:[%s619_s1 + $0x8] sm:$0xff]   ;;  %v435_v6 = vld [vmem:[%s621_s3 + $0x10] sm:$0xff]  }
   0x2   :  { %381 = vmatpush3.bf16.msra.mxu0 %v431_v0  ;;  %384 = vmatprep.mubr.msk.bf16.mxu0 %vm474_vm0, %v473_v1  ;;  %v433_v3 = vld [vmem:[%s621_s3] sm:$0xff]   ;;  %v434_v4 = vld [vmem:[%s621_s3 + $0x8] sm:$0xff]   ;;  %v436_v7 = vld [vmem:[%s621_s3 + $0x18] sm:$0xff]  }
   0x3   :  { %382 = vmatprep.subr.bf16.mxu0 %v473_v1  ;;  %404 = vmatprep.mubr.msk.bf16.mxu1 %vm474_vm0, %v473_v1  ;;  %v28_v5 = vld [vmem:[%s618_s0] sm:$0xf] }
   0x4   :  { %389 = vmatpush3.bf16.msra.mxu1 %v433_v3 }
   0x5   :  { %390 = vmatprep.subr.bf16.mxu1 %v473_v1 }
   0x6   :  { %383 = vmatpush3.bf16.msra.mxu0 %v432_v2 }
   0x7   :  { %408 = vmatprep.subr.bf16.mxu0 %v473_v1 }
   0x8   :  { %391 = vmatpush3.bf16.msra.mxu1 %v434_v4 }
   0x9   :  { %385 = vmatmul.mubr.msk.bf16.vlgmr.msra.gmra.mrb[0].mxu0 %vm52_vm1, %v28_v5  ;;  %392 = vmatprep.subr.bf16.mxu1 %v473_v1 }
   0xa   :  { %424 = vmatprep.mubr.msk.bf16.mxu0 %vm474_vm0, %v473_v1 }
   0xc   :  { %393 = vmatpush3.bf16.msra.mxu1 %v435_v6 }
   0xd   :  { %394 = vmatprep.subr.bf16.mxu1 %v473_v1 }
   0xe   :  { %12 = vsyncpa [#allocation3], 0  ;;  %v437_v8 = vld [vmem:[%s621_s3 + $0x20] sm:$0xff]   ;;  %v438_v9 = vld [vmem:[%s621_s3 + $0x28] sm:$0xff]   ;;  %s475_s16 = smov [#allocation2]  }
   0xf   :  { %v439_v10 = vld [vmem:[%s621_s3 + $0x30] sm:$0xff]   ;;  %v440_v11 = vld [vmem:[%s621_s3 + $0x38] sm:$0xff]   ;;  %v441_v12 = vld [vmem:[%s623_s5] sm:$0xff]   ;;  %s329_s17 = sshll.u32 %s475_s16, 4  ;;  %s330_s17 = int_to_ptr.vmem [resolvable:$true] %s329_s17 }
  0x10   :  { %395 = vmatpush3.bf16.msra.mxu1 %v436_v7  ;;  %409 = vmatpush3.bf16.msra.mxu0 %v441_v12  ;;  %v442_v13 = vld [vmem:[%s623_s5 + $0x8] sm:$0xff]   ;;  %v443_v14 = vld [vmem:[%s623_s5 + $0x10] sm:$0xff]   ;;  %v444_v15 = vld [vmem:[%s623_s5 + $0x18] sm:$0xff]   ;;  %p454_p1 = scmp.lt.s32.totalorder %s330_s17, %s330_s17 }
  0x11   :  { %396 = vmatprep.subr.bf16.mxu1 %v473_v1  ;;  %410 = vmatprep.subr.bf16.mxu0 %v473_v1  ;;  %v445_v16 = vld [vmem:[%s623_s5 + $0x20] sm:$0xff]   ;;  %v446_v17 = vld [vmem:[%s623_s5 + $0x28] sm:$0xff]   ;;  %v447_v26 = vld [vmem:[%s623_s5 + $0x30] sm:$0xff]  }
  0x12   :  { %v337_v18 = vld [vmem:[%s620_s2] ss:$0 sm:$0xff]  ;;  %v448_v27 = vld [vmem:[%s623_s5 + $0x38] sm:$0xff]  }
  0x13   :  { %v341_v28 = vld [vmem:[%s622_s4] ss:$0 sm:$0xff]  ;;  %s449_s4 = scalar_lea.vmem %s330_s17, 128 }
  0x14   :  { %397 = vmatpush3.bf16.msra.mxu1 %v437_v8  ;;  %411 = vmatpush3.bf16.msra.mxu0 %v442_v13  ;;  %v350_v36 = vld [vmem:[%s624_s6] ss:$0 sm:$0xff]  ;;  %p450_p0 = scmp.ne.s32.totalorder %s330_s17, %s449_s4  ;;  %p455_p2 = scmp.lt.s32.totalorder %s449_s4, %s449_s4 }
  0x15   :  { %398 = vmatprep.subr.bf16.mxu1 %v473_v1  ;;  %412 = vmatprep.subr.bf16.mxu0 %v473_v1 }
  0x16   :  { %p456_p3 = por %p455_p2, %p454_p1 }
  0x18   :  { %399 = vmatpush3.bf16.msra.mxu1 %v438_v9  ;;  %413 = vmatpush3.bf16.msra.mxu0 %v443_v14  ;;  %p457_p4 = pnand %p456_p3, %p450_p0 }
  0x19   :  { %400 = vmatprep.subr.bf16.mxu1 %v473_v1  ;;  %414 = vmatprep.subr.bf16.mxu0 %v473_v1 }
  0x1c   :  { %401 = vmatpush3.bf16.msra.mxu1 %v439_v10  ;;  %415 = vmatpush3.bf16.msra.mxu0 %v444_v15 }
  0x1d   :  { %402 = vmatprep.subr.bf16.mxu1 %v473_v1  ;;  %416 = vmatprep.subr.bf16.mxu0 %v473_v1 }
  0x20   :  { %403 = vmatpush3.bf16.msra.mxu1 %v440_v11  ;;  %417 = vmatpush3.bf16.msra.mxu0 %v445_v16 }
  0x21   :  { %418 = vmatprep.subr.bf16.mxu0 %v473_v1 }
  0x24   :  { %419 = vmatpush3.bf16.msra.mxu0 %v446_v17 }
  0x25   :  { %420 = vmatprep.subr.bf16.mxu0 %v473_v1 }
  0x28   :  { %421 = vmatpush3.bf16.msra.mxu0 %v447_v26 }
  0x29   :  { %422 = vmatprep.subr.bf16.mxu0 %v473_v1 }
  0x2c   :  { %423 = vmatpush3.bf16.msra.mxu0 %v448_v27 }
  0xdc   :  { %v90_v19 = vpop.f32.mrb[0].mxu0 }
  0xdd   :  { %v91_v20 = vadd.f32 %v337_v18, %v90_v19  ;;  %v386_v21 = vpop.f32.mrb[1].mxu0 }
  0xde   :  { %v93_v22 = vpop.f32.mrb[2].mxu0 }
  0xdf   :  { %v96_v23 = vmax.f32 %v91_v20, 0.0  ;;  %v387_v24 = vpop.f32.mrb[3].mxu0 }
  0xe1   :  { %v97_v25 = vpack.c.bf16 %v96_v23, %v96_v23 }
  0xe3   :  { %405 = vmatmul.mubr.bf16.vlgmr.msra.gmra.mrb[0].mxu1 %v97_v25 }
 0x1b6   :  { %v203_v29 = vpop.f32.mrb[0].mxu1 }
 0x1b7   :  { %v204_v30 = vadd.f32 %v341_v28, %v203_v29  ;;  %v406_v31 = vpop.f32.mrb[1].mxu1 }
 0x1b8   :  { %v206_v32 = vpop.f32.mrb[2].mxu1 }
 0x1b9   :  { %v209_v33 = vmax.f32 %v204_v30, 0.0  ;;  %v407_v34 = vpop.f32.mrb[3].mxu1 }
 0x1bb   :  { %v210_v35 = vpack.c.bf16 %v209_v33, %v209_v33 }
 0x1bd   :  { %425 = vmatmul.mubr.bf16.vlgmr.msra.gmra.mrb[4].mxu0 %v210_v35 }
 0x290   :  { %v316_v37 = vpop.f32.mrb[4].mxu0 }
 0x291   :  { %v317_v38 = vadd.f32 %v350_v36, %v316_v37  ;;  %v426_v39 = vpop.f32.mrb[5].mxu0 }
 0x292   :  { %v319_v40 = vpop.f32.mrb[6].mxu0 }
 0x293   :  { %322 = vst [vmem:[#allocation2] sm:$0xff] %v317_v38  ;;  %v427_v41 = vpop.f32.mrb[7].mxu0 }
 0x294   :  { %460 = shalt.err (!%p457_p4)
}
 0x295   :  { %s461_s6 = scalar_lea.hbm %s625_s7, 128 }
 0x296   :  { %p462_p5 = scmp.ne.s32.totalorder %s625_s7, %s461_s6  ;;  %p465_p6 = scmp.lt.u32.totalorder %s461_s6, %s625_s7 }
 0x298   :  { %p467_p7 = pnand %p465_p6, %p462_p5 }
 0x29a   :  { %470 = shalt.err (!%p467_p7)
}
 0x29b   :  { %332 = dma.vmem_to_hbm [thread:$0]  %s330_s17, 128, %s625_s7, [#allocation3]  }
 0x29c   :  { %471 = dma.done.wait [#allocation3], 128  }
 0x29d   :  { %472 = vsyncadd [#allocation3], 4294967168 }
 0x29e   :  { %336 = vsyncpa [#allocation3], 1 }

</bundles_post_ra>
